<compile_context>
chip_gen: v7x
topology: tpu7x:2x2x1
jax: 0.10.0
libtpu: 0.0.40
codegen_flags: <defaults>
</compile_context>

<pallas_src>
import functools

import jax
import jax.numpy as jnp
import numpy as np
from jax.experimental import pallas as pl
from jax.experimental.pallas import tpu as pltpu


# ----------------------------------------------------------------------------
# Fused kernel: projector math per batch sample + in-place BN + ReLU at the end
# ----------------------------------------------------------------------------
def _projector_kernel(x_ref, t_ref, wx_ref, bx_ref, wt_ref, bt_ref,
                      gamma_ref, beta_ref, out_ref, *,
                      hw, cout, inv_count, eps, matmul_dtype):
    n = pl.program_id(0)

    x = x_ref[...]                      # (HW, Cin)
    t = t_ref[...]                      # (L, D)

    # Fused shared-LHS matmuls: one MXU push per operand, Cout+tc columns.
    #   px = [ downsample(x) | linear1(x) ]   (HW, Cout+tc)
    #   pt = [ linear3(t)    | linear2(t) ]   (L,  Cout+tc)
    px = jnp.dot(x, wx_ref[...], preferred_element_type=jnp.float32) + bx_ref[...]
    pt = jnp.dot(t, wt_ref[...], preferred_element_type=jnp.float32) + bt_ref[...]

    xd = px[:, :cout]                   # downsample(x)  (HW, Cout)
    x_q = px[:, cout:]                  # linear1(x)     (HW, tc)
    t3 = pt[:, :cout]                   # linear3(t)     (L, Cout)
    t_q = pt[:, cout:]                  # linear2(t)     (L, tc)

    # Attention scores in lane-dense orientation: s[l, q] = <t_q[l], x_q[q]>.
    # Shape (L, HW): 128 lanes carry HW, softmax reductions run over the short
    # L sublane axis, divide goes to the EUP via approx reciprocal.
    s = jax.lax.dot_general(t_q, x_q, (((1,), (1,)), ((), ())),
                            preferred_element_type=jnp.float32)     # (L, HW)
    s = s - jnp.max(s, axis=0, keepdims=True)
    p = jnp.exp(s)
    p = p * pl.reciprocal(jnp.sum(p, axis=0, keepdims=True), approx=True)

    # av[q, c] = sum_l p[l, q] * t3[l, c]  -> (HW, Cout)
    av = jax.lax.dot_general(p.astype(matmul_dtype), t3.astype(matmul_dtype),
                             (((0,), (0,)), ((), ())),
                             preferred_element_type=jnp.float32)

    row = pl.multiple_of(n * hw, hw)
    out_ref[pl.ds(row, hw), :] = xd + av

    # Last step: BatchNorm1d (training-mode batch stats, biased variance) and
    # ReLU applied in place to the VMEM-resident output, then a single HBM
    # writeback happens when the grid finishes.  Two-pass mean/variance avoids
    # the E[y^2] - E[y]^2 cancellation issue.
    @pl.when(n == pl.num_programs(0) - 1)
    def _():
        y = out_ref[...]                                        # (N*HW, Cout)
        mean = jnp.sum(y, axis=0, keepdims=True) * inv_count    # (1, Cout)
        yc = y - mean
        var = jnp.sum(yc * yc, axis=0, keepdims=True) * inv_count
        scale = gamma_ref[...] * jax.lax.rsqrt(var + eps)
        shift = beta_ref[...] - mean * scale
        out_ref[...] = jnp.maximum(y * scale + shift, 0.0)


# ----------------------------------------------------------------------------
# Wrapper
# ----------------------------------------------------------------------------
def projector_forward(x, t, params, *, matmul_dtype=jnp.float32):
    N, HW, Cin = x.shape
    _, L, D = t.shape
    tc = params["w1"].shape[0]
    Cout = params["w3"].shape[0]
    F = Cout + tc

    # Fused, pre-transposed weights (one matmul per LHS inside the kernel).
    w1t = params["w1"].T                          # (Cin, tc)
    wdt = params["wd"].T                          # (Cin, Cout)
    w2t = params["w2"].T                          # (D, tc)
    w3t = params["w3"].T                          # (tc, Cout)
    wx = jnp.concatenate([wdt, w1t], axis=1).astype(matmul_dtype)   # (Cin, F)
    wt = jnp.concatenate([w3t, w2t], axis=1).astype(matmul_dtype)   # (D, F)
    zeros_tc = jnp.zeros((tc,), jnp.float32)
    bx = jnp.concatenate([params["bd"].astype(jnp.float32), zeros_tc]).reshape(1, F)
    bt = jnp.concatenate([params["b3"].astype(jnp.float32), zeros_tc]).reshape(1, F)
    gamma = params["bn_gamma"].reshape(1, Cout).astype(jnp.float32)
    beta = params["bn_beta"].reshape(1, Cout).astype(jnp.float32)

    # Flatten batch into the row (sublane) dimension: all in-kernel math is 2-D.
    x2 = x.reshape(N * HW, Cin).astype(matmul_dtype)
    t2 = t.reshape(N * L, D).astype(matmul_dtype)

    # The whole (N*HW, Cout) output stays VMEM-resident across the grid so the
    # BN + ReLU can run in place without a y HBM round-trip.
    resident_bytes = N * HW * Cout * 4
    assert resident_bytes <= 24 * 1024 * 1024, (
        "resident output exceeds conservative VMEM budget")
    # TODO(synk): fall back to a two-pass (stats then normalize) variant when
    # N*HW*Cout*4B does not fit VMEM (v7x has only 64 MiB per TensorCore).

    kernel = functools.partial(
        _projector_kernel,
        hw=HW, cout=Cout, inv_count=1.0 / float(N * HW), eps=1e-5,
        matmul_dtype=matmul_dtype)

    out2 = pl.pallas_call(
        kernel,
        out_shape=jax.ShapeDtypeStruct((N * HW, Cout), jnp.float32),
        grid_spec=pltpu.PrefetchScalarGridSpec(
            num_scalar_prefetch=0,
            grid=(N,),
            in_specs=[
                pl.BlockSpec((HW, Cin), lambda n: (n, 0)),   # x rows of sample n
                pl.BlockSpec((L, D), lambda n: (n, 0)),      # t rows of sample n
                pl.BlockSpec((Cin, F), lambda n: (0, 0)),    # fused W_x (resident)
                pl.BlockSpec((1, F), lambda n: (0, 0)),      # fused bias_x
                pl.BlockSpec((D, F), lambda n: (0, 0)),      # fused W_t (resident)
                pl.BlockSpec((1, F), lambda n: (0, 0)),      # fused bias_t
                pl.BlockSpec((1, Cout), lambda n: (0, 0)),   # bn gamma
                pl.BlockSpec((1, Cout), lambda n: (0, 0)),   # bn beta
            ],
            # Constant index map -> output block is VMEM-resident across the
            # whole grid and written back to HBM exactly once at the end.
            out_specs=pl.BlockSpec((N * HW, Cout), lambda n: (0, 0)),
        ),
        compiler_params=pltpu.CompilerParams(
            dimension_semantics=("arbitrary",)),
    )(x2, t2, wx, bx, wt, bt, gamma, beta)

    return out2.reshape(N, HW, Cout)


# ----------------------------------------------------------------------------
# Pure-JAX reference (numerical sanity check, mirrors the PyTorch module)
# ----------------------------------------------------------------------------
def projector_ref(x, t, params):
    x_q = x @ params["w1"].T
    t_q = t @ params["w2"].T
    a = jax.nn.softmax(jnp.einsum("nqd,nld->nql", x_q, t_q), axis=-1)
    t3 = t @ params["w3"].T + params["b3"]
    av = jnp.einsum("nql,nlc->nqc", a, t3)
    xd = x @ params["wd"].T + params["bd"]
    y = xd + av
    mean = jnp.mean(y, axis=(0, 1))
    var = jnp.var(y, axis=(0, 1))
    yn = (y - mean) / jnp.sqrt(var + 1e-5) * params["bn_gamma"] + params["bn_beta"]
    return jax.nn.relu(yn)


def xavier_normal(key, shape):
    fan_out, fan_in = shape
    std = float(np.sqrt(2.0 / (fan_in + fan_out)))
    return jax.random.normal(key, shape, jnp.float32) * std


if __name__ == "__main__":
    # Small shapes consistent with the module's forward contract
    # (in_channels=32, out_channels=64, token_channels=32 => D == 32).
    N, HW, Cin, Cout, TC, L = 2, 128, 32, 64, 32, 8

    key = jax.random.PRNGKey(0)
    kx, kt, k1, k2, k3, kb3, kd, kbd = jax.random.split(key, 8)

    x = jax.random.normal(kx, (N, HW, Cin), jnp.float32)
    t = jax.random.normal(kt, (N, L, TC), jnp.float32)

    params = {
        "w1": xavier_normal(k1, (TC, Cin)),          # linear1 weight (no bias)
        "w2": xavier_normal(k2, (TC, TC)),           # linear2 weight (no bias)
        "w3": xavier_normal(k3, (Cout, TC)),         # linear3 weight
        "b3": jax.random.normal(kb3, (Cout,), jnp.float32) * 0.1,
        "wd": xavier_normal(kd, (Cout, Cin)),        # downsample linear weight
        "bd": jax.random.normal(kbd, (Cout,), jnp.float32) * 0.1,
        "bn_gamma": jnp.ones((Cout,), jnp.float32),  # BatchNorm default init
        "bn_beta": jnp.zeros((Cout,), jnp.float32),
    }

    # Default matmul_dtype=f32 keeps module-faithful numerics; pass
    # matmul_dtype=jnp.bfloat16 on v6e/v7x for peak MXU rate.
    out = projector_forward(x, t, params)
    out = jax.block_until_ready(out)

    ref = projector_ref(x, t, params)
    # Tolerance accounts for the EUP approximate reciprocal in the softmax.
    np.testing.assert_allclose(np.asarray(out), np.asarray(ref),
                               rtol=5e-3, atol=5e-3)

    print("KERNEL_OK")
</pallas_src>

<mosaic_0001>
module attributes {stable_mosaic.version = 11 : i64} {
  func.func @_projector_kernel(%arg0: i32, %arg1: memref<128x32xf32, #tpu.memory_space<vmem>>, %arg2: memref<8x32xf32, #tpu.memory_space<vmem>>, %arg3: memref<32x96xf32, #tpu.memory_space<vmem>>, %arg4: memref<1x96xf32, #tpu.memory_space<vmem>>, %arg5: memref<32x96xf32, #tpu.memory_space<vmem>>, %arg6: memref<1x96xf32, #tpu.memory_space<vmem>>, %arg7: memref<1x64xf32, #tpu.memory_space<vmem>>, %arg8: memref<1x64xf32, #tpu.memory_space<vmem>>, %arg9: memref<256x64xf32, #tpu.memory_space<vmem>>) attributes {dimension_semantics = [#tpu.dimension_semantics<arbitrary>], iteration_bounds = array<i64: 2>, scalar_prefetch = 0 : i64, scratch_operands = 0 : i64, tpu.core_type = #tpu.core_type<tc>, window_params = [{transform_indices = @transform_0, window_bounds = array<i64: 128, 32>}, {transform_indices = @transform_1, window_bounds = array<i64: 8, 32>}, {pipeline_mode = #tpu.pipeline_mode<synchronous>, transform_indices = @transform_2, window_bounds = array<i64: 32, 96>}, {pipeline_mode = #tpu.pipeline_mode<synchronous>, transform_indices = @transform_3, window_bounds = array<i64: 1, 96>}, {pipeline_mode = #tpu.pipeline_mode<synchronous>, transform_indices = @transform_4, window_bounds = array<i64: 32, 96>}, {pipeline_mode = #tpu.pipeline_mode<synchronous>, transform_indices = @transform_5, window_bounds = array<i64: 1, 96>}, {pipeline_mode = #tpu.pipeline_mode<synchronous>, transform_indices = @transform_6, window_bounds = array<i64: 1, 64>}, {pipeline_mode = #tpu.pipeline_mode<synchronous>, transform_indices = @transform_7, window_bounds = array<i64: 1, 64>}, {pipeline_mode = #tpu.pipeline_mode<synchronous>, transform_indices = @transform_8, window_bounds = array<i64: 256, 64>}]} {
    %c0 = arith.constant 0 : index
    %c0_0 = arith.constant 0 : index
    %0 = vector.load %arg1[%c0, %c0_0] : memref<128x32xf32, #tpu.memory_space<vmem>>, vector<128x32xf32>
    %c0_1 = arith.constant 0 : index
    %c0_2 = arith.constant 0 : index
    %1 = vector.load %arg2[%c0_1, %c0_2] : memref<8x32xf32, #tpu.memory_space<vmem>>, vector<8x32xf32>
    %c0_3 = arith.constant 0 : index
    %c0_4 = arith.constant 0 : index
    %2 = vector.load %arg3[%c0_3, %c0_4] : memref<32x96xf32, #tpu.memory_space<vmem>>, vector<32x96xf32>
    %cst = arith.constant dense<0.000000e+00> : vector<128x96xf32>
    %3 = tpu.matmul %0, %2, %cst {dimension_numbers = #tpu.dot_dimension_numbers<[1], [0], [0], [1], [0, 0, 1, 1], [], []>} : vector<128x32xf32>, vector<32x96xf32>, vector<128x96xf32> -> vector<128x96xf32>
    %c0_5 = arith.constant 0 : index
    %c0_6 = arith.constant 0 : index
    %4 = vector.load %arg4[%c0_5, %c0_6] : memref<1x96xf32, #tpu.memory_space<vmem>>, vector<1x96xf32>
    %5 = vector.broadcast %4 : vector<1x96xf32> to vector<128x96xf32>
    %6 = arith.addf %3, %5 : vector<128x96xf32>
    %c0_7 = arith.constant 0 : index
    %c0_8 = arith.constant 0 : index
    %7 = vector.load %arg5[%c0_7, %c0_8] : memref<32x96xf32, #tpu.memory_space<vmem>>, vector<32x96xf32>
    %cst_9 = arith.constant dense<0.000000e+00> : vector<8x96xf32>
    %8 = tpu.matmul %1, %7, %cst_9 {dimension_numbers = #tpu.dot_dimension_numbers<[1], [0], [0], [1], [0, 0, 1, 1], [], []>} : vector<8x32xf32>, vector<32x96xf32>, vector<8x96xf32> -> vector<8x96xf32>
    %c0_10 = arith.constant 0 : index
    %c0_11 = arith.constant 0 : index
    %9 = vector.load %arg6[%c0_10, %c0_11] : memref<1x96xf32, #tpu.memory_space<vmem>>, vector<1x96xf32>
    %10 = vector.broadcast %9 : vector<1x96xf32> to vector<8x96xf32>
    %11 = arith.addf %8, %10 : vector<8x96xf32>
    %12 = vector.extract_strided_slice %6 {offsets = [0, 0], sizes = [128, 64], strides = [1, 1]} : vector<128x96xf32> to vector<128x64xf32>
    %13 = vector.extract_strided_slice %6 {offsets = [0, 64], sizes = [128, 32], strides = [1, 1]} : vector<128x96xf32> to vector<128x32xf32>
    %14 = vector.extract_strided_slice %11 {offsets = [0, 0], sizes = [8, 64], strides = [1, 1]} : vector<8x96xf32> to vector<8x64xf32>
    %15 = vector.extract_strided_slice %11 {offsets = [0, 64], sizes = [8, 32], strides = [1, 1]} : vector<8x96xf32> to vector<8x32xf32>
    %cst_12 = arith.constant dense<0.000000e+00> : vector<8x128xf32>
    %16 = tpu.matmul %15, %13, %cst_12 {dimension_numbers = #tpu.dot_dimension_numbers<[1], [1], [0], [0], [0, 0, 1, 0], [], []>} : vector<8x32xf32>, vector<128x32xf32>, vector<8x128xf32> -> vector<8x128xf32>
    %cst_13 = arith.constant dense<0xFF800000> : vector<128xf32>
    %17 = vector.multi_reduction <maximumf>, %16, %cst_13 [0] : vector<8x128xf32> to vector<128xf32>
    %18 = vector.shape_cast %17 : vector<128xf32> to vector<1x128xf32>
    %19 = vector.broadcast %18 : vector<1x128xf32> to vector<8x128xf32>
    %20 = arith.subf %16, %19 : vector<8x128xf32>
    %21 = math.exp %20 : vector<8x128xf32>
    %cst_14 = arith.constant dense<0.000000e+00> : vector<128xf32>
    %22 = vector.multi_reduction <add>, %21, %cst_14 [0] : vector<8x128xf32> to vector<128xf32>
    %23 = vector.shape_cast %22 : vector<128xf32> to vector<1x128xf32>
    %24 = tpu.reciprocal %23 {approx = true} : vector<1x128xf32> -> vector<1x128xf32>
    %25 = vector.broadcast %24 : vector<1x128xf32> to vector<8x128xf32>
    %26 = arith.mulf %21, %25 : vector<8x128xf32>
    %cst_15 = arith.constant dense<0.000000e+00> : vector<128x64xf32>
    %27 = tpu.matmul %26, %14, %cst_15 {dimension_numbers = #tpu.dot_dimension_numbers<[0], [0], [1], [1], [0, 1, 1, 1], [], []>} : vector<8x128xf32>, vector<8x64xf32>, vector<128x64xf32> -> vector<128x64xf32>
    %c128_i32 = arith.constant 128 : i32
    %28 = arith.muli %arg0, %c128_i32 : i32
    %29 = tpu.assume_multiple %28, 128 : i32
    %30 = arith.addf %12, %27 : vector<128x64xf32>
    %31 = arith.index_cast %29 : i32 to index
    %c0_16 = arith.constant 0 : index
    %32 = vector.load %arg9[%31, %c0_16] : memref<256x64xf32, #tpu.memory_space<vmem>>, vector<128x64xf32>
    tpu.vector_store %arg9[%31, %c0_16], %30 {strides = array<i32>} : memref<256x64xf32, #tpu.memory_space<vmem>>, vector<128x64xf32>,
    %c1_i32 = arith.constant 1 : i32
    %33 = arith.cmpi eq, %arg0, %c1_i32 : i32
    %34 = arith.extui %33 : i1 to i32
    %c0_i32 = arith.constant 0 : i32
    %35 = arith.cmpi ne, %34, %c0_i32 : i32
    scf.if %35 {
      %c0_17 = arith.constant 0 : index
      %c0_18 = arith.constant 0 : index
      %36 = vector.load %arg9[%c0_17, %c0_18] : memref<256x64xf32, #tpu.memory_space<vmem>>, vector<256x64xf32>
      %cst_19 = arith.constant dense<0.000000e+00> : vector<64xf32>
      %37 = vector.multi_reduction <add>, %36, %cst_19 [0] : vector<256x64xf32> to vector<64xf32>
      %38 = vector.shape_cast %37 : vector<64xf32> to vector<1x64xf32>
      %cst_20 = arith.constant 3.906250e-03 : f32
      %39 = vector.broadcast %cst_20 : f32 to vector<1x64xf32>
      %40 = arith.mulf %38, %39 : vector<1x64xf32>
      %41 = vector.broadcast %40 : vector<1x64xf32> to vector<256x64xf32>
      %42 = arith.subf %36, %41 : vector<256x64xf32>
      %43 = arith.mulf %42, %42 : vector<256x64xf32>
      %cst_21 = arith.constant dense<0.000000e+00> : vector<64xf32>
      %44 = vector.multi_reduction <add>, %43, %cst_21 [0] : vector<256x64xf32> to vector<64xf32>
      %45 = vector.shape_cast %44 : vector<64xf32> to vector<1x64xf32>
      %cst_22 = arith.constant 3.906250e-03 : f32
      %46 = vector.broadcast %cst_22 : f32 to vector<1x64xf32>
      %47 = arith.mulf %45, %46 : vector<1x64xf32>
      %c0_23 = arith.constant 0 : index
      %c0_24 = arith.constant 0 : index
      %48 = vector.load %arg7[%c0_23, %c0_24] : memref<1x64xf32, #tpu.memory_space<vmem>>, vector<1x64xf32>
      %cst_25 = arith.constant 9.99999974E-6 : f32
      %49 = vector.broadcast %cst_25 : f32 to vector<1x64xf32>
      %50 = arith.addf %47, %49 : vector<1x64xf32>
      %51 = math.rsqrt %50 : vector<1x64xf32>
      %52 = arith.mulf %48, %51 : vector<1x64xf32>
      %c0_26 = arith.constant 0 : index
      %c0_27 = arith.constant 0 : index
      %53 = vector.load %arg8[%c0_26, %c0_27] : memref<1x64xf32, #tpu.memory_space<vmem>>, vector<1x64xf32>
      %54 = arith.mulf %40, %52 : vector<1x64xf32>
      %55 = arith.subf %53, %54 : vector<1x64xf32>
      %56 = vector.broadcast %52 : vector<1x64xf32> to vector<256x64xf32>
      %57 = arith.mulf %36, %56 : vector<256x64xf32>
      %58 = vector.broadcast %55 : vector<1x64xf32> to vector<256x64xf32>
      %59 = arith.addf %57, %58 : vector<256x64xf32>
      %cst_28 = arith.constant 0.000000e+00 : f32
      %60 = vector.broadcast %cst_28 : f32 to vector<256x64xf32>
      %61 = arith.maximumf %59, %60 : vector<256x64xf32>
      %c0_29 = arith.constant 0 : index
      %c0_30 = arith.constant 0 : index
      %62 = vector.load %arg9[%c0_29, %c0_30] : memref<256x64xf32, #tpu.memory_space<vmem>>, vector<256x64xf32>
      tpu.vector_store %arg9[%c0_29, %c0_30], %61 {strides = array<i32>} : memref<256x64xf32, #tpu.memory_space<vmem>>, vector<256x64xf32>,
    } else {
    }
    return
  }
  func.func @transform_0(%arg0: i32) -> (i32, i32) {
    %c0_i32 = arith.constant 0 : i32
    %c0_i32_0 = arith.constant 0 : i32
    return %arg0, %c0_i32 : i32, i32
  }
  func.func @transform_1(%arg0: i32) -> (i32, i32) {
    %c0_i32 = arith.constant 0 : i32
    %c0_i32_0 = arith.constant 0 : i32
    return %arg0, %c0_i32 : i32, i32
  }
  func.func @transform_2(%arg0: i32) -> (i32, i32) {
    %c0_i32 = arith.constant 0 : i32
    %c0_i32_0 = arith.constant 0 : i32
    %c0_i32_1 = arith.constant 0 : i32
    return %c0_i32, %c0_i32_0 : i32, i32
  }
  func.func @transform_3(%arg0: i32) -> (i32, i32) {
    %c0_i32 = arith.constant 0 : i32
    %c0_i32_0 = arith.constant 0 : i32
    %c0_i32_1 = arith.constant 0 : i32
    return %c0_i32, %c0_i32_0 : i32, i32
  }
  func.func @transform_4(%arg0: i32) -> (i32, i32) {
    %c0_i32 = arith.constant 0 : i32
    %c0_i32_0 = arith.constant 0 : i32
    %c0_i32_1 = arith.constant 0 : i32
    return %c0_i32, %c0_i32_0 : i32, i32
  }
  func.func @transform_5(%arg0: i32) -> (i32, i32) {
    %c0_i32 = arith.constant 0 : i32
    %c0_i32_0 = arith.constant 0 : i32
    %c0_i32_1 = arith.constant 0 : i32
    return %c0_i32, %c0_i32_0 : i32, i32
  }
  func.func @transform_6(%arg0: i32) -> (i32, i32) {
    %c0_i32 = arith.constant 0 : i32
    %c0_i32_0 = arith.constant 0 : i32
    %c0_i32_1 = arith.constant 0 : i32
    return %c0_i32, %c0_i32_0 : i32, i32
  }
  func.func @transform_7(%arg0: i32) -> (i32, i32) {
    %c0_i32 = arith.constant 0 : i32
    %c0_i32_0 = arith.constant 0 : i32
    %c0_i32_1 = arith.constant 0 : i32
    return %c0_i32, %c0_i32_0 : i32, i32
  }
  func.func @transform_8(%arg0: i32) -> (i32, i32) {
    %c0_i32 = arith.constant 0 : i32
    %c0_i32_0 = arith.constant 0 : i32
    %c0_i32_1 = arith.constant 0 : i32
    return %c0_i32, %c0_i32_0 : i32, i32
  }
}

</mosaic_0001>

<bundles_post_ra>
// kernel: tpu_custom_call.1
= control target key start
LH: loop header
LB: loop body
LE: loop exit
PB: predicated region body
PF: predicated region fallthrough
CT: control target
= control target key end

     0   :  { %s1865_s27 = smov 0   ;;  %s2678_s0 = inlined_call_operand.vmem [shape: f32[256,32], index: 0, kind: input, shape index: {}]   ;;  %s2679_s1 = inlined_call_operand.vmem [shape: f32[16,32], index: 1, kind: input, shape index: {}]   ;;  %s2680_s2 = inlined_call_operand.vmem [shape: f32[32,96], index: 2, kind: input, shape index: {}]   ;;  %s2681_s3 = inlined_call_operand.vmem [shape: f32[1,96], index: 3, kind: input, shape index: {}]   ;;  %s2682_s4 = inlined_call_operand.vmem [shape: f32[32,96], index: 4, kind: input, shape index: {}]   ;;  %s2683_s5 = inlined_call_operand.vmem [shape: f32[1,96], index: 5, kind: input, shape index: {}]   ;;  %s2684_s6 = inlined_call_operand.vmem [shape: f32[1,64], index: 6, kind: input, shape index: {}]   ;;  %s2685_s7 = inlined_call_operand.vmem [shape: f32[1,64], index: 7, kind: input, shape index: {}]   ;;  %s2686_s8 = inlined_call_operand.vmem [shape: f32[256,64], index: 8, kind: output, shape index: {}]  }
   0x1 LB: > { %s1871_s28 = sadd.s32 4294967295, %s1814_s27   ;;  %p1481_p0 = scmp.ge.s32.totalorder %s1814_s27, 1  ;;  %s1814_s27 = sphi %s1865_s27, %s18_s27  }
   0x2   : > { %p267_p1 = scmp.lt.s32.totalorder %s1814_s27, 3 }
   0x4   : > { %p268_p2 = pnand %p1481_p0, %p267_p1 }
   0x5   : > { %v327_v0 = vld [vmem:[%s2680_s2] sm:$0xff] (!%p268_p2)  ;;  %v328_v1 = vld [vmem:[%s2680_s2 + $0x8] sm:$0xff] (!%p268_p2)  ;;  %v329_v2 = vld [vmem:[%s2680_s2 + $0x10] sm:$0xff] (!%p268_p2)  ;;  %s1482_s13 = sshll.u32 (!%p268_p2), %s1871_s28, 4  ;;  %v1816_v5 = vmov (!%p268_p2), 0.0|0.0   ;;  %vm1817_vm0 = vmmov (!%p268_p2), 0  }
   0x6   : > { %271 = sbr.rel (%p268_p2) target bundleno = 1299 (0x513), region = 52  ;;  %v1704_v3 = vpack.c.bf16 (!%p268_p2), %v328_v1, %v327_v0  ;;  %v330_v4 = vld [vmem:[%s2680_s2 + $0x18] sm:$0xff] (!%p268_p2)  ;;  %p1888_p3 = scmp.lt.s32.totalorder (!%p268_p2), %s1482_s13, 31  ;;  %1712 = vmatprep.subr.bf16.mxu1 (!%p268_p2), %v1816_v5  ;;  %v532_v6 = vld [vmem:[%s2682_s4] sm:$0xff] (!%p268_p2)  ;;  %v533_v7 = vld [vmem:[%s2682_s4 + $0x8] sm:$0xff] (!%p268_p2)  ;;  %v1818_v12 = vmov (!%p268_p2), 0.0  }
   0x7   : > { %v1708_v8 = vpack.c.bf16 (!%p268_p2), %v330_v4, %v329_v2  ;;  %v1713_v9 = vpack.c.bf16 (!%p268_p2), %v533_v7, %v532_v6  ;;  %v534_v10 = vld [vmem:[%s2682_s4 + $0x10] sm:$0xff] (!%p268_p2)  ;;  %v535_v11 = vld [vmem:[%s2682_s4 + $0x18] sm:$0xff] (!%p268_p2)  ;;  %1640 = vmatprep.mubr.msk.f32.mxu1 (!%p268_p2), %vm1817_vm0, %v1818_v12  ;;  %p306_p4 = scmp.lt.s32.totalorder (!%p268_p2), %s1871_s28, 1  ;;  %vm338_vm1 = vcmask (!%p268_p2), 261120   ;;  %v1485_v31 = vld [vmem:[%s2681_s3] ss:$0 sm:$0xff] (!%p268_p2) }
   0x8   : > { %1705 = vmatprep.subr.bf16.mxu0 (!%p268_p2), %v1704_v3  ;;  %v1716_v13 = vpack.c.bf16 (!%p268_p2), %v535_v11, %v534_v10  ;;  %v1502_v33 = vld [vmem:[%s2683_s5] ss:$0 sm:$0xff] (!%p268_p2)  ;;  %s1819_s18 = smov (!%p268_p2), 64   ;;  %vm2019_vm2 = vmpackc.low (!%p268_p2), %vm338_vm1, %vm338_vm1  ;;  %vm820_vm3 = vcmask (!%p268_p2), 64512   ;;  %s1537_s19 = sshll.u32 (!%p268_p2), %s1871_s28, 7  ;;  %vm1032_vm4 = vcmask (!%p268_p2), 523264  }
   0x9   : > { %1707 = vmatpush3.bf16.msra.mxu0 (!%p268_p2), %v1704_v3  ;;  %1714 = vmatpush3.bf16.msra.mxu1 (!%p268_p2), %v1713_v9  ;;  %s2067_s22 = scalar_lea.vmem (!%p268_p2), %s2686_s8, %s1537_s19  ;;  %p1538_p5 = scmp.ne.s32.totalorder (!%p268_p2), %s1871_s28, 1 }
   0xa   : > { %1709 = vmatprep.subr.bf16.mxu0 (!%p268_p2), %v1708_v8  ;;  %1715 = vmatprep.subr.bf16.mxu1 (!%p268_p2), %v1816_v5 }
   0xd   : > { %s2691_s13 = smov (!%p1888_p3, %s1482_s13), 31  ;;  %1711 = vmatpush3.bf16.msra.mxu0 %v1708_v8  ;;  %1717 = vmatpush3.bf16.msra.mxu1 %v1716_v13 }
   0xe   : > { %s307_s25 = scalar_select %p306_p4, %s1871_s28, 1  ;;  %1718 = vmatprep.subr.bf16.mxu0 %v1816_v5 }
   0xf   : > { %s1483_s26 = sshll.u32 %s2691_s13, 3 }
  0x10   : > { %s1914_s9 = scalar_lea.vmem %s2678_s0, %s1483_s26  ;;  %s1484_s10 = sshll.u32 %s307_s25, 3 }
  0x11   : > { %v310_v14 = vld [vmem:[%s1914_s9] sm:$0xff]  ;;  %v311_v15 = vld [vmem:[%s1914_s9 + $0x8] sm:$0xff]  ;;  %v312_v16 = vld [vmem:[%s1914_s9 + $0x10] sm:$0xff]  ;;  %s309_s13 = scalar_lea.vmem %s2679_s1, %s1484_s10 }
  0x12   : > { %1608 = vmatprep.mubr.msk.f32.mxu0 %vm338_vm1, %v310_v14  ;;  %v313_v17 = vld [vmem:[%s1914_s9 + $0x18] sm:$0xff]  ;;  %v326_v18 = vld [vmem:[%s309_s13] sm:$0xff]  ;;  %v315_v20 = vld [vmem:[%s1914_s9 + $0x28] sm:$0xff] }
  0x13   : > { %1609 = vmatmul.mubr.msk.f32.vlgmr.msra.gmra.mrb[0].mxu0 %vm338_vm1, %v311_v15  ;;  %v314_v19 = vld [vmem:[%s1914_s9 + $0x20] sm:$0xff]  ;;  %1641 = vmatmul.mubr.msk.f32.vlgmr.msra.gmra.mrb[0].mxu1 %vm338_vm1, %v326_v18  ;;  %v316_v21 = vld [vmem:[%s1914_s9 + $0x30] sm:$0xff]  ;;  %v317_v22 = vld [vmem:[%s1914_s9 + $0x38] sm:$0xff] }
  0x14   : > { %1611 = vmatprep.mubr.msk.f32.mxu0 %vm338_vm1, %v312_v16  ;;  %v318_v23 = vld [vmem:[%s1914_s9 + $0x40] sm:$0xff]  ;;  %v319_v24 = vld [vmem:[%s1914_s9 + $0x48] sm:$0xff]  ;;  %v320_v25 = vld [vmem:[%s1914_s9 + $0x50] sm:$0xff] }
  0x15   : > { %v321_v26 = vld [vmem:[%s1914_s9 + $0x58] sm:$0xff]  ;;  %v322_v27 = vld [vmem:[%s1914_s9 + $0x60] sm:$0xff]  ;;  %v323_v28 = vld [vmem:[%s1914_s9 + $0x68] sm:$0xff] }
  0x16   : > { %v324_v29 = vld [vmem:[%s1914_s9 + $0x70] sm:$0xff]  ;;  %v325_v30 = vld [vmem:[%s1914_s9 + $0x78] sm:$0xff] }
  0x17   : > { %1612 = vmatmul.mubr.msk.f32.gmra.mrb[2].mxu0 %vm338_vm1, %v313_v17 }
  0x18   : > { %1614 = vmatprep.mubr.msk.f32.mxu0 %vm338_vm1, %v314_v19 }
  0x1b   : > { %1615 = vmatmul.mubr.msk.f32.gmra.mrb[4].mxu0 %vm338_vm1, %v315_v20 }
  0x1c   : > { %1617 = vmatprep.mubr.msk.f32.mxu0 %vm338_vm1, %v316_v21 }
  0x1f   : > { %1618 = vmatmul.mubr.msk.f32.gmra.mrb[6].mxu0 %vm338_vm1, %v317_v22 }
  0x20   : > { %1620 = vmatprep.mubr.msk.f32.mxu0 %vm338_vm1, %v318_v23 }
  0x23   : > { %1621 = vmatmul.mubr.msk.f32.gmra.mrb[8].mxu0 %vm338_vm1, %v319_v24 }
  0x24   : > { %1623 = vmatprep.mubr.msk.f32.mxu0 %vm338_vm1, %v320_v25 }
  0x27   : > { %1624 = vmatmul.mubr.msk.f32.gmra.mrb[10].mxu0 %vm338_vm1, %v321_v26 }
  0x28   : > { %1626 = vmatprep.mubr.msk.f32.mxu0 %vm338_vm1, %v322_v27 }
  0x2b   : > { %1627 = vmatmul.mubr.msk.f32.gmra.mrb[12].mxu0 %vm338_vm1, %v323_v28 }
  0x2c   : > { %1629 = vmatprep.mubr.msk.f32.mxu0 %vm338_vm1, %v324_v29 }
  0x2f   : > { %1630 = vmatmul.mubr.msk.f32.gmra.mrb[14].mxu0 %vm338_vm1, %v325_v30 }
  0x30   : > { %1675 = vmatprep.mubr.msk.f32.mxu0 %vm1817_vm0, %v1818_v12 }
  0xe6   : > { %v1610_v32 = vpop.f32.mrb[0].mxu0  ;;  %v612_v37 = vpop.f32.mrb[0].mxu1 }
  0xe7   : > { %v1960_v34 = vadd.f32 %v1610_v32, %v1485_v31  ;;  %v453_v35 = vpop.f32.mrb[1].mxu0  ;;  %v613_v38 = vadd.f32 %v1502_v33, %v612_v37  ;;  %v1642_v39 = vpop.f32.mrb[1].mxu1 }
  0xe8   : > { %v1962_v36 = vadd.f32 %v1485_v31, %v453_v35 }
  0xe9   : > { %1678 = vmatprep.subr.mxu1 %v613_v38 }
  0xea   : > { %v1762_v40 = vpack.i.bf16 %v1960_v34, %v1962_v36  ;;  %v1613_v41 = vpop.f32.mrb[2].mxu0  ;;  %1679 = vmatpush3.msra.mxu1 %v613_v38 }
  0xeb   : > { %v1966_v42 = vadd.f32 %v1613_v41, %v1485_v31  ;;  %v463_v43 = vpop.f32.mrb[3].mxu0 }
  0xec   : > { %1763 = vrot.lane.b32.xlu0 %v1762_v40, %s1819_s18  ;;  %v1969_v44 = vadd.f32 %v1485_v31, %v463_v43 }
  0xee   : > { %v1767_v45 = vpack.i.bf16 %v1966_v42, %v1969_v44  ;;  %v1616_v46 = vpop.f32.mrb[4].mxu0 }
  0xef   : > { %v1973_v47 = vadd.f32 %v1616_v46, %v1485_v31  ;;  %v473_v48 = vpop.f32.mrb[5].mxu0 }
  0xf0   : > { %1768 = vrot.lane.b32.xlu0 %v1767_v45, %s1819_s18  ;;  %v1976_v49 = vadd.f32 %v1485_v31, %v473_v48 }
  0xf2   : > { %v1772_v50 = vpack.i.bf16 %v1973_v47, %v1976_v49  ;;  %v1619_v51 = vpop.f32.mrb[6].mxu0 }
  0xf3   : > { %v1980_v52 = vadd.f32 %v1619_v51, %v1485_v31  ;;  %v483_v53 = vpop.f32.mrb[7].mxu0 }
  0xf4   : > { %1773 = vrot.lane.b32.xlu1 %v1772_v50, %s1819_s18  ;;  %v1983_v54 = vadd.f32 %v1485_v31, %v483_v53 }
  0xf6   : > { %v1777_v55 = vpack.i.bf16 %v1980_v52, %v1983_v54  ;;  %v1622_v56 = vpop.f32.mrb[8].mxu0 }
  0xf7   : > { %v1987_v57 = vadd.f32 %v1622_v56, %v1485_v31  ;;  %v493_v58 = vpop.f32.mrb[9].mxu0 }
  0xf8   : > { %1778 = vrot.lane.b32.xlu1 %v1777_v55, %s1819_s18  ;;  %v1990_v59 = vadd.f32 %v1485_v31, %v493_v58 }
  0xfa   : > { %v1782_v60 = vpack.i.bf16 %v1987_v57, %v1990_v59  ;;  %v1625_v61 = vpop.f32.mrb[10].mxu0 }
  0xfb   : > { %v1994_v62 = vadd.f32 %v1625_v61, %v1485_v31  ;;  %v503_v63 = vpop.f32.mrb[11].mxu0 }
  0xfc   : > { %1783 = vrot.lane.b32.xlu0 %v1782_v60, %s1819_s18  ;;  %v1997_v0 = vadd.f32 %v1485_v31, %v503_v63 }
  0xfe   : > { %v1787_v1 = vpack.i.bf16 %v1994_v62, %v1997_v0  ;;  %v1628_v2 = vpop.f32.mrb[12].mxu0 }
  0xff   : > { %v2001_v3 = vadd.f32 %v1628_v2, %v1485_v31  ;;  %v513_v4 = vpop.f32.mrb[13].mxu0 }
 0x100   : > { %1788 = vrot.lane.b32.xlu1 %v1787_v1, %s1819_s18  ;;  %v2004_v6 = vadd.f32 %v1485_v31, %v513_v4 }
 0x102   : > { %v1792_v7 = vpack.i.bf16 %v2001_v3, %v2004_v6  ;;  %v1631_v8 = vpop.f32.mrb[14].mxu0 }
 0x103   : > { %v2008_v9 = vadd.f32 %v1631_v8, %v1485_v31  ;;  %v523_v10 = vpop.f32.mrb[15].mxu0 }
 0x104   : > { %1793 = vrot.lane.b32.xlu0 %v1792_v7, %s1819_s18  ;;  %v2011_v11 = vadd.f32 %v1485_v31, %v523_v10 }
 0x106   : > { %v1797_v12 = vpack.i.bf16 %v2008_v9, %v2011_v11 }
 0x108   : > { %1798 = vrot.lane.b32.xlu1 %v1797_v12, %s1819_s18  ;;  %617 = vrot.lane.b32.xlu0 %v613_v38, %s1819_s18 }
 0x15e   : > { %v1764_v13 = vpop.permute.xlu0 %1763 }
 0x15f   : > { %v1766_v14 = vunpack.i.h.bf16 %v1764_v13  ;;  %v1765_v15 = vunpack.i.l.bf16 %v1764_v13 }
 0x161   : > { %v1719_v17 = vpack.c.bf16 %v1766_v14, %v1765_v15 }
 0x162   : > { %v1769_v18 = vpop.permute.xlu0 %1768 }
 0x163   : > { %1721 = vmatpush3.bf16.xpose.msk.msra.mxu0 %vm2019_vm2, %v1719_v17  ;;  %v1771_v19 = vunpack.i.h.bf16 %v1769_v18  ;;  %v1770_v20 = vunpack.i.l.bf16 %v1769_v18 }
 0x164   : > { %1722 = vmatprep.subr.bf16.mxu0 %v1816_v5 }
 0x165   : > { %v1723_v21 = vpack.c.bf16 %v1771_v19, %v1770_v20 }
 0x166   : > { %v1774_v22 = vpop.permute.xlu1 %1773 }
 0x167   : > { %v1776_v23 = vunpack.i.h.bf16 %v1774_v22  ;;  %v1775_v24 = vunpack.i.l.bf16 %v1774_v22 }
 0x169   : > { %v1727_v25 = vpack.c.bf16 %v1776_v23, %v1775_v24 }
 0x16a   : > { %v1779_v26 = vpop.permute.xlu1 %1778 }
 0x16b   : > { %1725 = vmatpush3.bf16.xpose.msk.msra.mxu0 %vm2019_vm2, %v1723_v21  ;;  %v1781_v27 = vunpack.i.h.bf16 %v1779_v26  ;;  %v1780_v28 = vunpack.i.l.bf16 %v1779_v26 }
 0x16c   : > { %1726 = vmatprep.subr.bf16.mxu0 %v1816_v5 }
 0x16d   : > { %v1731_v29 = vpack.c.bf16 %v1781_v27, %v1780_v28 }
 0x16e   : > { %v1784_v30 = vpop.permute.xlu0 %1783 }
 0x16f   : > { %v1786_v31 = vunpack.i.h.bf16 %v1784_v30  ;;  %v1785_v32 = vunpack.i.l.bf16 %v1784_v30 }
 0x171   : > { %v1735_v33 = vpack.c.bf16 %v1786_v31, %v1785_v32 }
 0x172   : > { %v1789_v35 = vpop.permute.xlu1 %1788 }
 0x173   : > { %1729 = vmatpush3.bf16.xpose.msk.msra.mxu0 %vm2019_vm2, %v1727_v25  ;;  %v1791_v37 = vunpack.i.h.bf16 %v1789_v35  ;;  %v1790_v38 = vunpack.i.l.bf16 %v1789_v35 }
 0x174   : > { %1730 = vmatprep.subr.bf16.mxu0 %v1816_v5 }
 0x175   : > { %v1739_v39 = vpack.c.bf16 %v1791_v37, %v1790_v38 }
 0x176   : > { %v1794_v40 = vpop.permute.xlu0 %1793 }
 0x177   : > { %v1796_v41 = vunpack.i.h.bf16 %v1794_v40  ;;  %v1795_v43 = vunpack.i.l.bf16 %v1794_v40 }
 0x179   : > { %v1743_v45 = vpack.c.bf16 %v1796_v41, %v1795_v43 }
 0x17a   : > { %v1799_v46 = vpop.permute.xlu1 %1798  ;;  %v618_v53 = vpop.permute.xlu0 %617 }
 0x17b   : > { %1733 = vmatpush3.bf16.xpose.msk.msra.mxu0 %vm2019_vm2, %v1731_v29  ;;  %v1801_v48 = vunpack.i.h.bf16 %v1799_v46  ;;  %v1800_v50 = vunpack.i.l.bf16 %v1799_v46 }
 0x17c   : > { %1734 = vmatprep.subr.bf16.mxu0 %v1816_v5 }
 0x17d   : > { %v1747_v51 = vpack.c.bf16 %v1801_v48, %v1800_v50 }
 0x183   : > { %1737 = vmatpush3.bf16.xpose.msk.msra.mxu0 %vm2019_vm2, %v1735_v33 }
 0x184   : > { %1738 = vmatprep.subr.bf16.mxu0 %v1816_v5 }
 0x18b   : > { %1741 = vmatpush3.bf16.xpose.msk.msra.mxu0 %vm2019_vm2, %v1739_v39 }
 0x18c   : > { %1742 = vmatprep.subr.bf16.mxu0 %v1816_v5 }
 0x193   : > { %1745 = vmatpush3.bf16.xpose.msk.msra.mxu0 %vm2019_vm2, %v1743_v45 }
 0x194   : > { %1746 = vmatprep.subr.bf16.mxu0 %v1816_v5 }
 0x19b   : > { %1749 = vmatpush3.bf16.xpose.msk.msra.mxu0 %vm2019_vm2, %v1747_v51 }
 0x1a2   : > { %1676 = vmatmul.mubr.msk.f32.vlgmr.msra.gmra.mrb[16].mxu0 %vm338_vm1, %v618_v53 }
 0x275   : > { %v767_v55 = vpop.f32.mrb[16].mxu0 }
 0x276   : > { %v771_v56 = vrot.slane %v767_v55, 4  ;;  %v1677_v58 = vpop.f32.mrb[17].mxu0 }
 0x278   : > { %v772_v60 = vmax.f32 %v767_v55, %v771_v56 }
 0x27a   : > { %v773_v61 = vrot.slane %v772_v60, 2 }
 0x27c   : > { %v774_v63 = vmax.f32 %v772_v60, %v773_v61 }
 0x27e   : > { %v775_v1 = vrot.slane %v774_v63, 1 }
 0x280   : > { %v776_v2 = vmax.f32 %v774_v63, %v775_v1 }
 0x282   : > { %v777_v4 = vsub.f32 %v767_v55, %v776_v2 }
 0x284   : > { %v778_v7 = vmul.f32 1.442695, %v777_v4 }
 0x286   : > { %1802 = vpow2.f32 %v778_v7 }
 0x290   : > { %v1803_v8 = vpop.eup %1802 }
 0x291   : > { %v780_v5 = vrot.slane %v1803_v8, 4 }
 0x293   : > { %v781_v10 = vadd.f32 %v1803_v8, %v780_v5 }
 0x295   : > { %v782_v12 = vrot.slane %v781_v10, 2 }
 0x297   : > { %v783_v13 = vadd.f32 %v782_v12, %v781_v10 }
 0x299   : > { %v784_v14 = vrot.slane %v783_v13, 1 }
 0x29b   : > { %v785_v15 = vadd.f32 %v784_v14, %v783_v13 }
 0x29d   : > { %1804 = vrcp.f32 %v785_v15 }
 0x2a7   : > { %v1805_v16 = vpop.eup %1804 }
 0x2a8   : > { %v787_v17 = vmul.f32 %v1805_v16, %v1803_v8 }
 0x2aa   : > { %788 = vxpose.xlu1.b32.start.end [1/1] (short) %v787_v17, 128 }
 0x32a   : > { %v804_v18 = vpop.trf.xlu1 }
 0x32b   : > { %1680 = vmatprep.mubr.msk.f32.mxu1 %vm820_vm3, %v804_v18 }
 0x32e   : > { %v805_v19 = vpop.trf.xlu1 }
 0x32f   : > { %1681 = vmatmul.mubr.msk.f32.vlgmr.msra.gmra.mrb[2].mxu1 %vm820_vm3, %v805_v19 }
 0x332   : > { %v806_v20 = vpop.trf.xlu1 }
 0x333   : > { %1683 = vmatprep.mubr.msk.f32.mxu1 %vm820_vm3, %v806_v20 }
 0x336   : > { %v807_v21 = vpop.trf.xlu1 }
 0x337   : > { %1684 = vmatmul.mubr.msk.f32.gmra.mrb[4].mxu1 %vm820_vm3, %v807_v21 }
 0x33a   : > { %v808_v22 = vpop.trf.xlu1 }
 0x33b   : > { %1686 = vmatprep.mubr.msk.f32.mxu1 %vm820_vm3, %v808_v22 }
 0x33e   : > { %v809_v23 = vpop.trf.xlu1 }
 0x33f   : > { %1687 = vmatmul.mubr.msk.f32.gmra.mrb[6].mxu1 %vm820_vm3, %v809_v23 }
 0x342   : > { %v810_v24 = vpop.trf.xlu1 }
 0x343   : > { %1689 = vmatprep.mubr.msk.f32.mxu1 %vm820_vm3, %v810_v24 }
 0x346   : > { %v811_v25 = vpop.trf.xlu1 }
 0x347   : > { %1690 = vmatmul.mubr.msk.f32.gmra.mrb[8].mxu1 %vm820_vm3, %v811_v25 }
 0x34a   : > { %v812_v26 = vpop.trf.xlu1 }
 0x34b   : > { %1692 = vmatprep.mubr.msk.f32.mxu1 %vm820_vm3, %v812_v26 }
 0x34e   : > { %v813_v27 = vpop.trf.xlu1 }
 0x34f   : > { %1693 = vmatmul.mubr.msk.f32.gmra.mrb[10].mxu1 %vm820_vm3, %v813_v27 }
 0x352   : > { %v814_v28 = vpop.trf.xlu1 }
 0x353   : > { %1695 = vmatprep.mubr.msk.f32.mxu1 %vm820_vm3, %v814_v28 }
 0x356   : > { %v815_v29 = vpop.trf.xlu1 }
 0x357   : > { %1696 = vmatmul.mubr.msk.f32.gmra.mrb[12].mxu1 %vm820_vm3, %v815_v29 }
 0x35a   : > { %v816_v30 = vpop.trf.xlu1 }
 0x35b   : > { %1698 = vmatprep.mubr.msk.f32.mxu1 %vm820_vm3, %v816_v30 }
 0x35e   : > { %v817_v31 = vpop.trf.xlu1 }
 0x35f   : > { %1699 = vmatmul.mubr.msk.f32.gmra.mrb[14].mxu1 %vm820_vm3, %v817_v31 }
 0x362   : > { %v818_v32 = vpop.trf.xlu1 }
 0x363   : > { %1701 = vmatprep.mubr.msk.f32.mxu1 %vm820_vm3, %v818_v32 }
 0x366   : > { %v819_v33 = vpop.trf.xlu1 }
 0x367   : > { %1702 = vmatmul.mubr.msk.f32.gmra.mrb[16].mxu1 %vm820_vm3, %v819_v33 }
 0x402   : > { %v1682_v35 = vpop.f32.mrb[2].mxu1 }
 0x403   : > { %v1016_v37 = vadd.f32 %v1682_v35, %v1960_v34  ;;  %v935_v38 = vpop.f32.mrb[3].mxu1 }
 0x404   : > { %v1015_v39 = vadd.f32 %v935_v38, %v1962_v36 }
 0x405   : > { %1034 = vst.msk [vmem:[%s2067_s22 + $0x8] sm:$0xff] %vm1032_vm4, %v1016_v37 }
 0x406   : > { %1033 = vst.msk [vmem:[%s2067_s22] sm:$0xff] %vm1032_vm4, %v1015_v39 }
 0x40a   : > { %v1685_v40 = vpop.f32.mrb[4].mxu1 }
 0x40b   : > { %v1018_v41 = vadd.f32 %v1685_v40, %v1966_v42  ;;  %v945_v43 = vpop.f32.mrb[5].mxu1 }
 0x40c   : > { %v1017_v45 = vadd.f32 %v945_v43, %v1969_v44 }
 0x40d   : > { %1036 = vst.msk [vmem:[%s2067_s22 + $0x18] sm:$0xff] %vm1032_vm4, %v1018_v41 }
 0x40e   : > { %1035 = vst.msk [vmem:[%s2067_s22 + $0x10] sm:$0xff] %vm1032_vm4, %v1017_v45 }
 0x412   : > { %v1688_v34 = vpop.f32.mrb[6].mxu1 }
 0x413   : > { %v1020_v36 = vadd.f32 %v1688_v34, %v1973_v47  ;;  %v955_v46 = vpop.f32.mrb[7].mxu1 }
 0x414   : > { %v1019_v48 = vadd.f32 %v955_v46, %v1976_v49 }
 0x415   : > { %1038 = vst.msk [vmem:[%s2067_s22 + $0x28] sm:$0xff] %vm1032_vm4, %v1020_v36 }
 0x416   : > { %1037 = vst.msk [vmem:[%s2067_s22 + $0x20] sm:$0xff] %vm1032_vm4, %v1019_v48 }
 0x41a   : > { %v1691_v42 = vpop.f32.mrb[8].mxu1 }
 0x41b   : > { %v1022_v44 = vadd.f32 %v1691_v42, %v1980_v52  ;;  %v965_v50 = vpop.f32.mrb[9].mxu1 }
 0x41c   : > { %v1021_v51 = vadd.f32 %v965_v50, %v1983_v54 }
 0x41d   : > { %1040 = vst.msk [vmem:[%s2067_s22 + $0x38] sm:$0xff] %vm1032_vm4, %v1022_v44 }
 0x41e   : > { %1039 = vst.msk [vmem:[%s2067_s22 + $0x30] sm:$0xff] %vm1032_vm4, %v1021_v51 }
 0x422   : > { %v1694_v47 = vpop.f32.mrb[10].mxu1 }
 0x423   : > { %v1024_v49 = vadd.f32 %v1694_v47, %v1987_v57  ;;  %v975_v53 = vpop.f32.mrb[11].mxu1 }
 0x424   : > { %v1023_v55 = vadd.f32 %v975_v53, %v1990_v59 }
 0x425   : > { %1042 = vst.msk [vmem:[%s2067_s22 + $0x48] sm:$0xff] %vm1032_vm4, %v1024_v49 }
 0x426   : > { %1041 = vst.msk [vmem:[%s2067_s22 + $0x40] sm:$0xff] %vm1032_vm4, %v1023_v55 }
 0x42a   : > { %v1697_v52 = vpop.f32.mrb[12].mxu1 }
 0x42b   : > { %v1026_v54 = vadd.f32 %v1697_v52, %v1994_v62  ;;  %v985_v56 = vpop.f32.mrb[13].mxu1 }
 0x42c   : > { %v1025_v58 = vadd.f32 %v985_v56, %v1997_v0 }
 0x42d   : > { %1044 = vst.msk [vmem:[%s2067_s22 + $0x58] sm:$0xff] %vm1032_vm4, %v1026_v54 }
 0x42e   : > { %1043 = vst.msk [vmem:[%s2067_s22 + $0x50] sm:$0xff] %vm1032_vm4, %v1025_v58 }
 0x432   : > { %v1700_v57 = vpop.f32.mrb[14].mxu1 }
 0x433   : > { %v1028_v60 = vadd.f32 %v1700_v57, %v2001_v3  ;;  %v995_v59 = vpop.f32.mrb[15].mxu1 }
 0x434   : > { %v1027_v61 = vadd.f32 %v995_v59, %v2004_v6 }
 0x435   : > { %1046 = vst.msk [vmem:[%s2067_s22 + $0x68] sm:$0xff] %vm1032_vm4, %v1028_v60 }
 0x436   : > { %1045 = vst.msk [vmem:[%s2067_s22 + $0x60] sm:$0xff] %vm1032_vm4, %v1027_v61 }
 0x438   : > { %1052 = sbr.rel (%p1538_p5) target bundleno = 1299 (0x513), region = 56 }
 0x43a   : > { %v1703_v63 = vpop.f32.mrb[16].mxu1 }
 0x43b   : > { %v1030_v62 = vadd.f32 %v1703_v63, %v2008_v9  ;;  %v1005_v1 = vpop.f32.mrb[17].mxu1 }
 0x43c   : > { %v1029_v0 = vadd.f32 %v1005_v1, %v2011_v11 }
 0x43d   : > { %1048 = vst.msk [vmem:[%s2067_s22 + $0x78] sm:$0xff] %vm1032_vm4, %v1030_v62 }
 0x43e   : > { %1047 = vst.msk [vmem:[%s2067_s22 + $0x70] sm:$0xff] %vm1032_vm4, %v1029_v0 }
 0x445   : > { %v2121_v3 = vld [vmem:[%s2686_s8] sm:$0xff]  ;;  %v2126_v6 = vld [vmem:[%s2686_s8 + $0x8] sm:$0xff]  ;;  %v2131_v9 = vld [vmem:[%s2686_s8 + $0x10] sm:$0xff] }
 0x446   : > { %v2136_v11 = vld [vmem:[%s2686_s8 + $0x18] sm:$0xff]  ;;  %v1085_v2 = vsel %vm1032_vm4, %v2121_v3, 0.0  ;;  %v1086_v4 = vsel %vm1032_vm4, %v2126_v6, 0.0  ;;  %v1088_v7 = vsel %vm1032_vm4, %v2131_v9, 0.0  ;;  %v2147_v8 = vld [vmem:[%s2686_s8 + $0x20] sm:$0xff]  ;;  %v2154_v12 = vld [vmem:[%s2686_s8 + $0x28] sm:$0xff] }
 0x447   : > { %v1087_v5 = vadd.f32 %v1086_v4, %v1085_v2  ;;  %v1090_v10 = vsel %vm1032_vm4, %v2136_v11, 0.0  ;;  %v1092_v14 = vsel %vm1032_vm4, %v2147_v8, 0.0  ;;  %v2161_v15 = vld [vmem:[%s2686_s8 + $0x30] sm:$0xff]  ;;  %v1094_v17 = vsel %vm1032_vm4, %v2154_v12, 0.0  ;;  %v2168_v18 = vld [vmem:[%s2686_s8 + $0x38] sm:$0xff]  ;;  %v2175_v21 = vld [vmem:[%s2686_s8 + $0x40] sm:$0xff] }
 0x448   : > { %v1096_v20 = vsel %vm1032_vm4, %v2161_v15, 0.0  ;;  %v1098_v23 = vsel %vm1032_vm4, %v2168_v18, 0.0  ;;  %v2182_v24 = vld [vmem:[%s2686_s8 + $0x48] sm:$0xff]  ;;  %v1100_v26 = vsel %vm1032_vm4, %v2175_v21, 0.0  ;;  %v2189_v27 = vld [vmem:[%s2686_s8 + $0x50] sm:$0xff]  ;;  %v2196_v30 = vld [vmem:[%s2686_s8 + $0x58] sm:$0xff] }
 0x449   : > { %v1089_v13 = vadd.f32 %v1088_v7, %v1087_v5  ;;  %v1102_v29 = vsel %vm1032_vm4, %v2182_v24, 0.0  ;;  %v1104_v32 = vsel %vm1032_vm4, %v2189_v27, 0.0  ;;  %v2203_v33 = vld [vmem:[%s2686_s8 + $0x60] sm:$0xff]  ;;  %v1106_v37 = vsel %vm1032_vm4, %v2196_v30, 0.0  ;;  %v2210_v38 = vld [vmem:[%s2686_s8 + $0x68] sm:$0xff]  ;;  %v2217_v41 = vld [vmem:[%s2686_s8 + $0x70] sm:$0xff] }
 0x44a   : > { %v1108_v40 = vsel %vm1032_vm4, %v2203_v33, 0.0  ;;  %v1110_v45 = vsel %vm1032_vm4, %v2210_v38, 0.0  ;;  %v2224_v34 = vld [vmem:[%s2686_s8 + $0x78] sm:$0xff]  ;;  %v1112_v46 = vsel %vm1032_vm4, %v2217_v41, 0.0  ;;  %v2231_v48 = vld [vmem:[%s2686_s8 + $0x80] sm:$0xff]  ;;  %v2238_v50 = vld [vmem:[%s2686_s8 + $0x88] sm:$0xff] }
 0x44b   : > { %v1091_v16 = vadd.f32 %v1090_v10, %v1089_v13  ;;  %v1114_v44 = vsel %vm1032_vm4, %v2224_v34, 0.0  ;;  %v1116_v47 = vsel %vm1032_vm4, %v2231_v48, 0.0  ;;  %v2245_v49 = vld [vmem:[%s2686_s8 + $0x90] sm:$0xff]  ;;  %v1118_v55 = vsel %vm1032_vm4, %v2238_v50, 0.0  ;;  %v2252_v52 = vld [vmem:[%s2686_s8 + $0x98] sm:$0xff]  ;;  %v2259_v58 = vld [vmem:[%s2686_s8 + $0xa0] sm:$0xff] }
 0x44c   : > { %v1120_v56 = vsel %vm1032_vm4, %v2245_v49, 0.0  ;;  %v1122_v60 = vsel %vm1032_vm4, %v2252_v52, 0.0  ;;  %v2266_v59 = vld [vmem:[%s2686_s8 + $0xa8] sm:$0xff]  ;;  %v1124_v63 = vsel %vm1032_vm4, %v2259_v58, 0.0  ;;  %v2273_v62 = vld [vmem:[%s2686_s8 + $0xb0] sm:$0xff]  ;;  %v2280_v2 = vld [vmem:[%s2686_s8 + $0xb8] sm:$0xff] }
 0x44d   : > { %v1093_v19 = vadd.f32 %v1092_v14, %v1091_v16  ;;  %v1126_v0 = vsel %vm1032_vm4, %v2266_v59, 0.0  ;;  %v1128_v7 = vsel %vm1032_vm4, %v2273_v62, 0.0  ;;  %v2287_v5 = vld [vmem:[%s2686_s8 + $0xc0] sm:$0xff]  ;;  %v1130_v13 = vsel %vm1032_vm4, %v2280_v2, 0.0  ;;  %v2294_v14 = vld [vmem:[%s2686_s8 + $0xc8] sm:$0xff] }
 0x44f   : > { %v1095_v22 = vadd.f32 %v1094_v17, %v1093_v19  ;;  %v1132_v17 = vsel %vm1032_vm4, %v2287_v5, 0.0  ;;  %v2301_v19 = vld [vmem:[%s2686_s8 + $0xd0] sm:$0xff] }
 0x451   : > { %v1097_v25 = vadd.f32 %v1096_v20, %v1095_v22  ;;  %v1134_v22 = vsel %vm1032_vm4, %v2294_v14, 0.0 }
 0x453   : > { %v1099_v28 = vadd.f32 %v1098_v23, %v1097_v25  ;;  %v2308_v23 = vld [vmem:[%s2686_s8 + $0xd8] sm:$0xff] }
 0x455   : > { %v1101_v31 = vadd.f32 %v1100_v26, %v1099_v28  ;;  %v1136_v26 = vsel %vm1032_vm4, %v2301_v19, 0.0  ;;  %v2315_v28 = vld [vmem:[%s2686_s8 + $0xe0] sm:$0xff] }
 0x457   : > { %v1103_v35 = vadd.f32 %v1102_v29, %v1101_v31  ;;  %v1138_v31 = vsel %vm1032_vm4, %v2308_v23, 0.0 }
 0x459   : > { %v1105_v39 = vadd.f32 %v1104_v32, %v1103_v35  ;;  %v2322_v32 = vld [vmem:[%s2686_s8 + $0xe8] sm:$0xff] }
 0x45b   : > { %v1107_v43 = vadd.f32 %v1106_v37, %v1105_v39  ;;  %v1140_v37 = vsel %vm1032_vm4, %v2315_v28, 0.0  ;;  %v2329_v39 = vld [vmem:[%s2686_s8 + $0xf0] sm:$0xff] }
 0x45d   : > { %v1109_v36 = vadd.f32 %v1108_v40, %v1107_v43  ;;  %v1142_v43 = vsel %vm1032_vm4, %v2322_v32, 0.0 }
 0x45f   : > { %v1111_v42 = vadd.f32 %v1110_v45, %v1109_v36  ;;  %v2336_v45 = vld [vmem:[%s2686_s8 + $0xf8] sm:$0xff] }
 0x461   : > { %v1113_v51 = vadd.f32 %v1112_v46, %v1111_v42  ;;  %v1144_v46 = vsel %vm1032_vm4, %v2329_v39, 0.0 }
 0x463   : > { %v1115_v53 = vadd.f32 %v1114_v44, %v1113_v51  ;;  %v1146_v44 = vsel %vm1032_vm4, %v2336_v45, 0.0 }
 0x465   : > { %v1117_v54 = vadd.f32 %v1116_v47, %v1115_v53 }
 0x467   : > { %v1119_v57 = vadd.f32 %v1118_v55, %v1117_v54 }
 0x469   : > { %v1121_v61 = vadd.f32 %v1120_v56, %v1119_v57 }
 0x46b   : > { %v1123_v1 = vadd.f32 %v1122_v60, %v1121_v61 }
 0x46d   : > { %v1125_v4 = vadd.f32 %v1124_v63, %v1123_v1 }
 0x46f   : > { %v1127_v10 = vadd.f32 %v1126_v0, %v1125_v4 }
 0x471   : > { %v1129_v16 = vadd.f32 %v1128_v7, %v1127_v10 }
 0x473   : > { %v1131_v20 = vadd.f32 %v1130_v13, %v1129_v16 }
 0x475   : > { %v1133_v25 = vadd.f32 %v1132_v17, %v1131_v20 }
 0x477   : > { %v1135_v29 = vadd.f32 %v1134_v22, %v1133_v25 }
 0x479   : > { %v1137_v35 = vadd.f32 %v1136_v26, %v1135_v29 }
 0x47b   : > { %v1139_v40 = vadd.f32 %v1138_v31, %v1137_v35 }
 0x47d   : > { %v1141_v36 = vadd.f32 %v1140_v37, %v1139_v40 }
 0x47f   : > { %v1143_v42 = vadd.f32 %v1142_v43, %v1141_v36 }
 0x481   : > { %v1145_v51 = vadd.f32 %v1144_v46, %v1143_v42 }
 0x483   : > { %v1147_v47 = vadd.f32 %v1146_v44, %v1145_v51 }
 0x485   : > { %v1148_v53 = vrot.slane %v1147_v47, 4 }
 0x487   : > { %v1149_v55 = vadd.f32 %v1148_v53, %v1147_v47 }
 0x489   : > { %v1150_v54 = vrot.slane %v1149_v55, 2 }
 0x48b   : > { %v1151_v56 = vadd.f32 %v1150_v54, %v1149_v55 }
 0x48d   : > { %v1152_v57 = vrot.slane %v1151_v56, 1 }
 0x48f   : > { %v1153_v60 = vadd.f32 %v1152_v57, %v1151_v56 }
 0x491   : > { %v2342_v61 = vmul.f32 0.00390625, %v1153_v60 }
 0x493   : > { %v1155_v63 = vsub.f32 %v2121_v3, %v2342_v61  ;;  %v1156_v1 = vsub.f32 %v2126_v6, %v2342_v61  ;;  %v1157_v0 = vsub.f32 %v2131_v9, %v2342_v61  ;;  %v1158_v4 = vsub.f32 %v2136_v11, %v2342_v61 }
 0x494   : > { %v1159_v7 = vsub.f32 %v2147_v8, %v2342_v61  ;;  %v1160_v17 = vsub.f32 %v2154_v12, %v2342_v61  ;;  %v1161_v22 = vsub.f32 %v2161_v15, %v2342_v61  ;;  %v1162_v37 = vsub.f32 %v2168_v18, %v2342_v61 }
 0x495   : > { %v1187_v10 = vmul.f32 %v1155_v63, %v1155_v63  ;;  %v1188_v13 = vmul.f32 %v1156_v1, %v1156_v1  ;;  %v1189_v16 = vmul.f32 %v1157_v0, %v1157_v0  ;;  %v1190_v20 = vmul.f32 %v1158_v4, %v1158_v4 }
 0x496   : > { %v1191_v25 = vmul.f32 %v1159_v7, %v1159_v7  ;;  %v1192_v40 = vmul.f32 %v1160_v17, %v1160_v17  ;;  %v1163_v46 = vsub.f32 %v2175_v21, %v2342_v61  ;;  %v1193_v42 = vmul.f32 %v1161_v22, %v1161_v22 }
 0x497   : > { %v1219_v26 = vsel %vm1032_vm4, %v1187_v10, 0.0  ;;  %v1220_v29 = vsel %vm1032_vm4, %v1188_v13, 0.0  ;;  %v1222_v31 = vsel %vm1032_vm4, %v1189_v16, 0.0  ;;  %v1224_v43 = vsel %vm1032_vm4, %v1190_v20, 0.0 }
 0x498   : > { %v1221_v35 = vadd.f32 %v1220_v29, %v1219_v26  ;;  %v1226_v44 = vsel %vm1032_vm4, %v1191_v25, 0.0  ;;  %v1164_v47 = vsub.f32 %v2182_v24, %v2342_v61  ;;  %v1194_v53 = vmul.f32 %v1162_v37, %v1162_v37 }
 0x499   : > { %v1228_v55 = vsel %vm1032_vm4, %v1192_v40, 0.0  ;;  %v1165_v56 = vsub.f32 %v2189_v27, %v2342_v61  ;;  %v1195_v57 = vmul.f32 %v1163_v46, %v1163_v46  ;;  %v1230_v60 = vsel %vm1032_vm4, %v1193_v42, 0.0 }
 0x49a   : > { %v1223_v36 = vadd.f32 %v1222_v31, %v1221_v35  ;;  %v1166_v1 = vsub.f32 %v2196_v30, %v2342_v61  ;;  %v1196_v0 = vmul.f32 %v1164_v47, %v1164_v47  ;;  %v1232_v4 = vsel %vm1032_vm4, %v1194_v53, 0.0 }
 0x49b   : > { %v1167_v10 = vsub.f32 %v2203_v33, %v2342_v61  ;;  %v1197_v13 = vmul.f32 %v1165_v56, %v1165_v56  ;;  %v1234_v16 = vsel %vm1032_vm4, %v1195_v57, 0.0  ;;  %v1168_v20 = vsub.f32 %v2210_v38, %v2342_v61 }
 0x49c   : > { %v1225_v51 = vadd.f32 %v1224_v43, %v1223_v36  ;;  %v1198_v22 = vmul.f32 %v1166_v1, %v1166_v1  ;;  %v1236_v25 = vsel %vm1032_vm4, %v1196_v0, 0.0  ;;  %v1169_v29 = vsub.f32 %v2217_v41, %v2342_v61 }
 0x49d   : > { %v1199_v31 = vmul.f32 %v1167_v10, %v1167_v10  ;;  %v1238_v35 = vsel %vm1032_vm4, %v1197_v13, 0.0  ;;  %v1170_v40 = vsub.f32 %v2224_v34, %v2342_v61  ;;  %v1200_v43 = vmul.f32 %v1168_v20, %v1168_v20 }
 0x49e   : > { %v1227_v54 = vadd.f32 %v1226_v44, %v1225_v51  ;;  %v1240_v36 = vsel %vm1032_vm4, %v1198_v22, 0.0  ;;  %v1171_v42 = vsub.f32 %v2231_v48, %v2342_v61  ;;  %v1201_v44 = vmul.f32 %v1169_v29, %v1169_v29 }
 0x49f   : > { %v1242_v51 = vsel %vm1032_vm4, %v1199_v31, 0.0  ;;  %v1172_v53 = vsub.f32 %v2238_v50, %v2342_v61  ;;  %v1173_v57 = vsub.f32 %v2245_v49, %v2342_v61  ;;  %v1174_v0 = vsub.f32 %v2252_v52, %v2342_v61 }
 0x4a0   : > { %v1229_v63 = vadd.f32 %v1228_v55, %v1227_v54  ;;  %v1202_v55 = vmul.f32 %v1170_v40, %v1170_v40  ;;  %v1244_v54 = vsel %vm1032_vm4, %v1200_v43, 0.0  ;;  %v1175_v13 = vsub.f32 %v2259_v58, %v2342_v61 }
 0x4a1   : > { %v1176_v22 = vsub.f32 %v2266_v59, %v2342_v61  ;;  %v1177_v31 = vsub.f32 %v2273_v62, %v2342_v61  ;;  %v1178_v43 = vsub.f32 %v2280_v2, %v2342_v61 }
 0x4a2   : > { %v1231_v7 = vadd.f32 %v1230_v60, %v1229_v63  ;;  %v1203_v60 = vmul.f32 %v1171_v42, %v1171_v42  ;;  %v1246_v63 = vsel %vm1032_vm4, %v1201_v44, 0.0  ;;  %v1179_v44 = vsub.f32 %v2287_v5, %v2342_v61 }
 0x4a4   : > { %v1233_v17 = vadd.f32 %v1232_v4, %v1231_v7  ;;  %v1204_v4 = vmul.f32 %v1172_v53, %v1172_v53  ;;  %v1248_v7 = vsel %vm1032_vm4, %v1202_v55, 0.0  ;;  %v1180_v55 = vsub.f32 %v2294_v14, %v2342_v61 }
 0x4a6   : > { %v1235_v26 = vadd.f32 %v1234_v16, %v1233_v17  ;;  %v1205_v16 = vmul.f32 %v1173_v57, %v1173_v57  ;;  %v1250_v17 = vsel %vm1032_vm4, %v1203_v60, 0.0  ;;  %v1181_v60 = vsub.f32 %v2301_v19, %v2342_v61 }
 0x4a8   : > { %v1237_v37 = vadd.f32 %v1236_v25, %v1235_v26  ;;  %v1206_v25 = vmul.f32 %v1174_v0, %v1174_v0  ;;  %v1252_v26 = vsel %vm1032_vm4, %v1204_v4, 0.0  ;;  %v1182_v4 = vsub.f32 %v2308_v23, %v2342_v61 }
 0x4aa   : > { %v1239_v46 = vadd.f32 %v1238_v35, %v1237_v37  ;;  %v1207_v35 = vmul.f32 %v1175_v13, %v1175_v13  ;;  %v1254_v37 = vsel %vm1032_vm4, %v1205_v16, 0.0  ;;  %v1183_v16 = vsub.f32 %v2315_v28, %v2342_v61 }
 0x4ac   : > { %v1241_v47 = vadd.f32 %v1240_v36, %v1239_v46  ;;  %v1208_v36 = vmul.f32 %v1176_v22, %v1176_v22  ;;  %v1256_v46 = vsel %vm1032_vm4, %v1206_v25, 0.0  ;;  %v1184_v25 = vsub.f32 %v2322_v32, %v2342_v61 }
 0x4ae   : > { %v1243_v56 = vadd.f32 %v1242_v51, %v1241_v47  ;;  %v1209_v51 = vmul.f32 %v1177_v31, %v1177_v31  ;;  %v1258_v47 = vsel %vm1032_vm4, %v1207_v35, 0.0  ;;  %v1185_v35 = vsub.f32 %v2329_v39, %v2342_v61 }
 0x4b0   : > { %v1245_v1 = vadd.f32 %v1244_v54, %v1243_v56  ;;  %v1210_v54 = vmul.f32 %v1178_v43, %v1178_v43  ;;  %v1260_v56 = vsel %vm1032_vm4, %v1208_v36, 0.0  ;;  %v1186_v36 = vsub.f32 %v2336_v45, %v2342_v61 }
 0x4b2   : > { %v1247_v10 = vadd.f32 %v1246_v63, %v1245_v1  ;;  %v1211_v63 = vmul.f32 %v1179_v44, %v1179_v44  ;;  %v1262_v1 = vsel %vm1032_vm4, %v1209_v51, 0.0  ;;  %v1217_v51 = vmul.f32 %v1185_v35, %v1185_v35 }
 0x4b4   : > { %v1249_v20 = vadd.f32 %v1248_v7, %v1247_v10  ;;  %v1212_v7 = vmul.f32 %v1180_v55, %v1180_v55  ;;  %v1264_v10 = vsel %vm1032_vm4, %v1210_v54, 0.0  ;;  %v1218_v55 = vmul.f32 %v1186_v36, %v1186_v36 }
 0x4b6   : > { %v1251_v29 = vadd.f32 %v1250_v17, %v1249_v20  ;;  %v1213_v17 = vmul.f32 %v1181_v60, %v1181_v60  ;;  %v1266_v20 = vsel %vm1032_vm4, %v1211_v63, 0.0  ;;  %v1280_v63 = vsel %vm1032_vm4, %v1218_v55, 0.0 }
 0x4b8   : > { %v1253_v40 = vadd.f32 %v1252_v26, %v1251_v29  ;;  %v1214_v26 = vmul.f32 %v1182_v4, %v1182_v4  ;;  %v1268_v29 = vsel %vm1032_vm4, %v1212_v7, 0.0 }
 0x4ba   : > { %v1255_v42 = vadd.f32 %v1254_v37, %v1253_v40  ;;  %v1215_v37 = vmul.f32 %v1183_v16, %v1183_v16  ;;  %v1270_v40 = vsel %vm1032_vm4, %v1213_v17, 0.0 }
 0x4bc   : > { %v1257_v53 = vadd.f32 %v1256_v46, %v1255_v42  ;;  %v1216_v46 = vmul.f32 %v1184_v25, %v1184_v25  ;;  %v1272_v42 = vsel %vm1032_vm4, %v1214_v26, 0.0  ;;  %v1297_v25 = vlaneseq }
 0x4be   : > { %v1259_v57 = vadd.f32 %v1258_v47, %v1257_v53  ;;  %v1274_v47 = vsel %vm1032_vm4, %v1215_v37, 0.0  ;;  %v1276_v54 = vsel %vm1032_vm4, %v1216_v46, 0.0  ;;  %v1298_v26 = vshrl.u32 %v1297_v25, 7 }
 0x4c0   : > { %v1261_v0 = vadd.f32 %v1260_v56, %v1259_v57  ;;  %v1278_v57 = vsel %vm1032_vm4, %v1217_v51, 0.0 }
 0x4c2   : > { %v1263_v13 = vadd.f32 %v1262_v1, %v1261_v0 }
 0x4c4   : > { %v1265_v22 = vadd.f32 %v1264_v10, %v1263_v13 }
 0x4c6   : > { %v1267_v31 = vadd.f32 %v1266_v20, %v1265_v22 }
 0x4c8   : > { %v1269_v43 = vadd.f32 %v1268_v29, %v1267_v31  ;;  %v1289_v29 = vld [vmem:[%s2684_s6] sm:$0x1]  ;;  %v1299_v31 = vsub.s32 0, %v1298_v26 }
 0x4ca   : > { %v1271_v44 = vadd.f32 %v1270_v40, %v1269_v43  ;;  %v1293_v40 = vld [vmem:[%s2685_s7] sm:$0x1] }
 0x4cc   : > { %v1273_v53 = vadd.f32 %v1272_v42, %v1271_v44 }
 0x4ce   : > { %v1275_v56 = vadd.f32 %v1274_v47, %v1273_v53 }
 0x4d0   : > { %v1277_v60 = vadd.f32 %v1276_v54, %v1275_v56 }
 0x4d2   : > { %v1279_v1 = vadd.f32 %v1278_v57, %v1277_v60 }
 0x4d4   : > { %v1281_v0 = vadd.f32 %v1280_v63, %v1279_v1 }
 0x4d6   : > { %v1282_v4 = vrot.slane %v1281_v0, 4 }
 0x4d8   : > { %v1283_v7 = vadd.f32 %v1282_v4, %v1281_v0 }
 0x4da   : > { %v1284_v10 = vrot.slane %v1283_v7, 2 }
 0x4dc   : > { %v1285_v13 = vadd.f32 %v1284_v10, %v1283_v7 }
 0x4de   : > { %v1286_v16 = vrot.slane %v1285_v13, 1 }
 0x4e0   : > { %v1287_v17 = vadd.f32 %v1286_v16, %v1285_v13 }
 0x4e2   : > { %v1288_v20 = vmul.f32 0.00390625, %v1287_v17 }
 0x4e4   : > { %v1290_v22 = vadd.f32 1e-05, %v1288_v20 }
 0x4e6   : > { %1806 = vrsqrt.f32 %v1290_v22 }
 0x4f0   : > { %v1807_v35 = vpop.eup %1806 }
 0x4f1   : > { %v1292_v37 = vmul.f32 %v1807_v35, %v1289_v29 }
 0x4f3   : > { %v1294_v43 = vmul.f32 %v1292_v37, %v2342_v61  ;;  %v2447_v36 = vrot.slane %v1292_v37, %v1299_v31 }
 0x4f5   : > { %v1295_v46 = vsub.f32 %v1293_v40, %v1294_v43  ;;  %v1302_v42 = vmul.f32 %v2447_v36, %v2121_v3  ;;  %v1303_v44 = vmul.f32 %v2447_v36, %v2126_v6  ;;  %v1304_v51 = vmul.f32 %v2447_v36, %v2131_v9 }
 0x4f6   : > { %v1305_v47 = vmul.f32 %v2447_v36, %v2136_v11  ;;  %v1306_v53 = vmul.f32 %v2447_v36, %v2147_v8  ;;  %v1307_v61 = vmul.f32 %v2447_v36, %v2154_v12  ;;  %v1308_v55 = vmul.f32 %v2447_v36, %v2161_v15 }
 0x4f7   : > { %v2463_v54 = vrot.slane %v1295_v46, %v1299_v31  ;;  %v1309_v3 = vmul.f32 %v2447_v36, %v2168_v18  ;;  %v1310_v6 = vmul.f32 %v2447_v36, %v2175_v21  ;;  %v1311_v9 = vmul.f32 %v2447_v36, %v2182_v24 }
 0x4f8   : > { %v1312_v11 = vmul.f32 %v2447_v36, %v2189_v27  ;;  %v1313_v8 = vmul.f32 %v2447_v36, %v2196_v30  ;;  %v1314_v12 = vmul.f32 %v2447_v36, %v2203_v33  ;;  %v1315_v15 = vmul.f32 %v2447_v36, %v2210_v38 }
 0x4f9   : > { %v1340_v18 = vadd.f32 %v2463_v54, %v1302_v42  ;;  %v1341_v56 = vadd.f32 %v2463_v54, %v1303_v44  ;;  %v1342_v21 = vadd.f32 %v2463_v54, %v1304_v51  ;;  %v1343_v24 = vadd.f32 %v2463_v54, %v1305_v47 }
 0x4fa   : > { %v1344_v57 = vadd.f32 %v2463_v54, %v1306_v53  ;;  %v1345_v27 = vadd.f32 %v2463_v54, %v1307_v61  ;;  %v1346_v30 = vadd.f32 %v2463_v54, %v1308_v55  ;;  %v1347_v60 = vadd.f32 %v2463_v54, %v1309_v3 }
 0x4fb   : > { %v1372_v33 = vmax.f32 %v1340_v18, 0.0  ;;  %v1373_v63 = vmax.f32 %v1341_v56, 0.0  ;;  %v1374_v1 = vmax.f32 %v1342_v21, 0.0  ;;  %v1375_v38 = vmax.f32 %v1343_v24, 0.0 }
 0x4fc   : > { %v1376_v0 = vmax.f32 %v1344_v57, 0.0  ;;  %v1377_v4 = vmax.f32 %v1345_v27, 0.0  ;;  %v1378_v7 = vmax.f32 %v1346_v30, 0.0  ;;  %v1379_v10 = vmax.f32 %v1347_v60, 0.0 }
 0x4fd   : > { %1404 = vst.msk [vmem:[%s2686_s8] sm:$0xff] %vm1032_vm4, %v1372_v33  ;;  %1405 = vst.msk [vmem:[%s2686_s8 + $0x8] sm:$0xff] %vm1032_vm4, %v1373_v63  ;;  %v1348_v13 = vadd.f32 %v2463_v54, %v1310_v6  ;;  %v1349_v16 = vadd.f32 %v2463_v54, %v1311_v9  ;;  %v1350_v17 = vadd.f32 %v2463_v54, %v1312_v11 }
 0x4fe   : > { %1406 = vst.msk [vmem:[%s2686_s8 + $0x10] sm:$0xff] %vm1032_vm4, %v1374_v1  ;;  %1407 = vst.msk [vmem:[%s2686_s8 + $0x18] sm:$0xff] %vm1032_vm4, %v1375_v38  ;;  %v1351_v20 = vadd.f32 %v2463_v54, %v1313_v8  ;;  %v1352_v22 = vadd.f32 %v2463_v54, %v1314_v12  ;;  %v1353_v25 = vadd.f32 %v2463_v54, %v1315_v15 }
 0x4ff   : > { %1408 = vst.msk [vmem:[%s2686_s8 + $0x20] sm:$0xff] %vm1032_vm4, %v1376_v0  ;;  %1409 = vst.msk [vmem:[%s2686_s8 + $0x28] sm:$0xff] %vm1032_vm4, %v1377_v4  ;;  %v1316_v26 = vmul.f32 %v2447_v36, %v2217_v41  ;;  %v1317_v29 = vmul.f32 %v2447_v36, %v2224_v34  ;;  %v1380_v31 = vmax.f32 %v1348_v13, 0.0  ;;  %v1381_v35 = vmax.f32 %v1349_v16, 0.0 }
 0x500   : > { %1410 = vst.msk [vmem:[%s2686_s8 + $0x30] sm:$0xff] %vm1032_vm4, %v1378_v7  ;;  %1411 = vst.msk [vmem:[%s2686_s8 + $0x38] sm:$0xff] %vm1032_vm4, %v1379_v10  ;;  %v1382_v37 = vmax.f32 %v1350_v17, 0.0  ;;  %v1383_v40 = vmax.f32 %v1351_v20, 0.0  ;;  %v1384_v43 = vmax.f32 %v1352_v22, 0.0  ;;  %v1385_v46 = vmax.f32 %v1353_v25, 0.0 }
 0x501   : > { %v1354_v42 = vadd.f32 %v2463_v54, %v1316_v26  ;;  %v1355_v44 = vadd.f32 %v2463_v54, %v1317_v29  ;;  %1412 = vst.msk [vmem:[%s2686_s8 + $0x40] sm:$0xff] %vm1032_vm4, %v1380_v31  ;;  %1413 = vst.msk [vmem:[%s2686_s8 + $0x48] sm:$0xff] %vm1032_vm4, %v1381_v35  ;;  %v1318_v41 = vmul.f32 %v2447_v36, %v2231_v48 }
 0x502   : > { %1414 = vst.msk [vmem:[%s2686_s8 + $0x50] sm:$0xff] %vm1032_vm4, %v1382_v37  ;;  %1415 = vst.msk [vmem:[%s2686_s8 + $0x58] sm:$0xff] %vm1032_vm4, %v1383_v40  ;;  %v1319_v34 = vmul.f32 %v2447_v36, %v2238_v50  ;;  %v1320_v51 = vmul.f32 %v2447_v36, %v2245_v49  ;;  %v1321_v47 = vmul.f32 %v2447_v36, %v2252_v52 }
 0x503   : > { %1416 = vst.msk [vmem:[%s2686_s8 + $0x60] sm:$0xff] %vm1032_vm4, %v1384_v43  ;;  %1417 = vst.msk [vmem:[%s2686_s8 + $0x68] sm:$0xff] %vm1032_vm4, %v1385_v46  ;;  %v1386_v48 = vmax.f32 %v1354_v42, 0.0  ;;  %v1387_v53 = vmax.f32 %v1355_v44, 0.0  ;;  %v1322_v50 = vmul.f32 %v2447_v36, %v2259_v58  ;;  %v1323_v49 = vmul.f32 %v2447_v36, %v2266_v59 }
 0x504   : > { %v1356_v52 = vadd.f32 %v2463_v54, %v1318_v41  ;;  %v1357_v61 = vadd.f32 %v2463_v54, %v1319_v34  ;;  %v1358_v55 = vadd.f32 %v2463_v54, %v1320_v51  ;;  %v1359_v3 = vadd.f32 %v2463_v54, %v1321_v47 }
 0x505   : > { %1418 = vst.msk [vmem:[%s2686_s8 + $0x70] sm:$0xff] %vm1032_vm4, %v1386_v48  ;;  %1419 = vst.msk [vmem:[%s2686_s8 + $0x78] sm:$0xff] %vm1032_vm4, %v1387_v53  ;;  %v1360_v58 = vadd.f32 %v2463_v54, %v1322_v50  ;;  %v1361_v59 = vadd.f32 %v2463_v54, %v1323_v49  ;;  %v1324_v6 = vmul.f32 %v2447_v36, %v2273_v62 }
 0x506   : > { %v1325_v9 = vmul.f32 %v2447_v36, %v2280_v2  ;;  %v1388_v11 = vmax.f32 %v1356_v52, 0.0  ;;  %v1389_v8 = vmax.f32 %v1357_v61, 0.0  ;;  %v1390_v12 = vmax.f32 %v1358_v55, 0.0 }
 0x507   : > { %v1391_v15 = vmax.f32 %v1359_v3, 0.0  ;;  %v1392_v18 = vmax.f32 %v1360_v58, 0.0  ;;  %v1393_v56 = vmax.f32 %v1361_v59, 0.0  ;;  %v1362_v21 = vadd.f32 %v2463_v54, %v1324_v6 }
 0x508   : > { %v1363_v24 = vadd.f32 %v2463_v54, %v1325_v9  ;;  %1420 = vst.msk [vmem:[%s2686_s8 + $0x80] sm:$0xff] %vm1032_vm4, %v1388_v11  ;;  %1421 = vst.msk [vmem:[%s2686_s8 + $0x88] sm:$0xff] %vm1032_vm4, %v1389_v8  ;;  %v1326_v62 = vmul.f32 %v2447_v36, %v2287_v5  ;;  %v1327_v2 = vmul.f32 %v2447_v36, %v2294_v14 }
 0x509   : > { %1422 = vst.msk [vmem:[%s2686_s8 + $0x90] sm:$0xff] %vm1032_vm4, %v1390_v12  ;;  %1423 = vst.msk [vmem:[%s2686_s8 + $0x98] sm:$0xff] %vm1032_vm4, %v1391_v15  ;;  %v1328_v57 = vmul.f32 %v2447_v36, %v2301_v19  ;;  %v1329_v27 = vmul.f32 %v2447_v36, %v2308_v23  ;;  %v1394_v5 = vmax.f32 %v1362_v21, 0.0  ;;  %v1330_v14 = vmul.f32 %v2447_v36, %v2315_v28 }
 0x50a   : > { %1424 = vst.msk [vmem:[%s2686_s8 + $0xa0] sm:$0xff] %vm1032_vm4, %v1392_v18  ;;  %1425 = vst.msk [vmem:[%s2686_s8 + $0xa8] sm:$0xff] %vm1032_vm4, %v1393_v56  ;;  %v1395_v30 = vmax.f32 %v1363_v24, 0.0  ;;  %v1331_v19 = vmul.f32 %v2447_v36, %v2322_v32  ;;  %v1364_v23 = vadd.f32 %v2463_v54, %v1326_v62  ;;  %v1365_v60 = vadd.f32 %v2463_v54, %v1327_v2 }
 0x50b   : > { %v1366_v33 = vadd.f32 %v2463_v54, %v1328_v57  ;;  %v1367_v63 = vadd.f32 %v2463_v54, %v1329_v27  ;;  %1426 = vst.msk [vmem:[%s2686_s8 + $0xb0] sm:$0xff] %vm1032_vm4, %v1394_v5  ;;  %v1368_v28 = vadd.f32 %v2463_v54, %v1330_v14  ;;  %v1332_v1 = vmul.f32 %v2447_v36, %v2329_v39 }
 0x50c   : > { %1427 = vst.msk [vmem:[%s2686_s8 + $0xb8] sm:$0xff] %vm1032_vm4, %v1395_v30  ;;  %v1369_v32 = vadd.f32 %v2463_v54, %v1331_v19  ;;  %v1333_v38 = vmul.f32 %v2447_v36, %v2336_v45  ;;  %v1396_v0 = vmax.f32 %v1364_v23, 0.0  ;;  %v1397_v4 = vmax.f32 %v1365_v60, 0.0 }
 0x50d   : > { %v1398_v7 = vmax.f32 %v1366_v33, 0.0  ;;  %v1399_v10 = vmax.f32 %v1367_v63, 0.0  ;;  %v1400_v13 = vmax.f32 %v1368_v28, 0.0  ;;  %v1370_v17 = vadd.f32 %v2463_v54, %v1332_v1 }
 0x50e   : > { %v1401_v16 = vmax.f32 %v1369_v32, 0.0  ;;  %v1371_v20 = vadd.f32 %v2463_v54, %v1333_v38  ;;  %1428 = vst.msk [vmem:[%s2686_s8 + $0xc0] sm:$0xff] %vm1032_vm4, %v1396_v0  ;;  %1429 = vst.msk [vmem:[%s2686_s8 + $0xc8] sm:$0xff] %vm1032_vm4, %v1397_v4 }
 0x50f   : > { %1430 = vst.msk [vmem:[%s2686_s8 + $0xd0] sm:$0xff] %vm1032_vm4, %v1398_v7  ;;  %1431 = vst.msk [vmem:[%s2686_s8 + $0xd8] sm:$0xff] %vm1032_vm4, %v1399_v10  ;;  %v1402_v39 = vmax.f32 %v1370_v17, 0.0 }
 0x510   : > { %1432 = vst.msk [vmem:[%s2686_s8 + $0xe0] sm:$0xff] %vm1032_vm4, %v1400_v13  ;;  %1433 = vst.msk [vmem:[%s2686_s8 + $0xe8] sm:$0xff] %vm1032_vm4, %v1401_v16  ;;  %v1403_v45 = vmax.f32 %v1371_v20, 0.0 }
 0x511   : > { %1434 = vst.msk [vmem:[%s2686_s8 + $0xf0] sm:$0xff] %vm1032_vm4, %v1402_v39 }
 0x512   : > { %1435 = vst.msk [vmem:[%s2686_s8 + $0xf8] sm:$0xff] %vm1032_vm4, %v1403_v45 }
 0x513 PF: > { %s18_s27 = sadd.s32 1, %s1814_s27  }
 0x514   : > { %p15_p6 = scmp.ge.s32.totalorder %s18_s27, 4  }
 0x516   :  { %17 = sbr.rel (!%p15_p6) target bundleno = 1 (0x1), region = 86 }

</bundles_post_ra>
